<compile_context>
chip_gen: v7x
topology: tpu7x:2x2x1
jax: 0.10.0
libtpu: 0.0.40
codegen_flags: <defaults>
</compile_context>

<pallas_src>
import math

import jax
import jax.numpy as jnp
from jax.experimental import pallas as pl
from jax.experimental.pallas import tpu as pltpu


def _round_up(x, m):
    return (x + m - 1) // m * m


def _soft_exponential_store(h_ref, v, alpha):
    """Store soft_exponential(v) into h_ref with a single store.

    alpha == 0 -> identity (no exp/log executed at runtime)
    alpha <  0 -> -log(1 - alpha*(x + alpha)) / alpha
    alpha >  0 -> (exp(alpha*x) - 1) / alpha + alpha

    The branch is chosen on the scalar alpha with pl.when so only the selected
    branch's EUP work runs, and each branch writes the bf16 scratch exactly
    once (no read-modify-write of the tile).
    NOTE: like PyTorch, the negative-alpha branch produces NaN/Inf when
    1 - alpha*(x + alpha) <= 0 (no clamping).
    """

    @pl.when(alpha == 0.0)
    def _():
        h_ref[...] = v.astype(h_ref.dtype)

    @pl.when(alpha < 0.0)
    def _():
        h_ref[...] = (-jnp.log(1.0 - alpha * (v + alpha)) / alpha).astype(h_ref.dtype)

    @pl.when(alpha > 0.0)
    def _():
        h_ref[...] = ((jnp.exp(alpha * v) - 1.0) / alpha + alpha).astype(h_ref.dtype)


def classifier_sexp_kernel(alphas_ref,                      # SMEM (3,) f32
                           x_ref,                           # (TB, 784) bf16
                           w1_ref, b1_ref,                  # (784,256) bf16, (1,256) f32
                           w2_ref, b2_ref,                  # (256,128) bf16, (1,128) f32
                           w3_ref, b3_ref,                  # (128, 64) bf16, (1, 64) f32
                           w4_ref, b4_ref,                  # ( 64,128) bf16, (1,128) f32 (padded)
                           o_ref,                           # (TB, 128) f32 (cols >= 10 are junk)
                           h1_ref, h2_ref, h3_ref):         # VMEM bf16 scratch
    # Read the SMEM scalars once, up front (kept off any hot path).
    a1 = alphas_ref[0]
    a2 = alphas_ref[1]
    a3 = alphas_ref[2]

    # fc1 + soft_exponential(256): bf16 MXU inputs, f32 accumulation.
    z1 = jnp.dot(x_ref[...], w1_ref[...],
                 preferred_element_type=jnp.float32) + b1_ref[...]
    _soft_exponential_store(h1_ref, z1, a1)

    # fc2 + soft_exponential(128): next matmul reads the bf16 scratch directly.
    z2 = jnp.dot(h1_ref[...], w2_ref[...],
                 preferred_element_type=jnp.float32) + b2_ref[...]
    _soft_exponential_store(h2_ref, z2, a2)

    # fc3 + soft_exponential(64)
    z3 = jnp.dot(h2_ref[...], w3_ref[...],
                 preferred_element_type=jnp.float32) + b3_ref[...]
    _soft_exponential_store(h3_ref, z3, a3)

    # fc4 (lane-padded to 128 outputs) + log_softmax(dim=1), all in f32.
    # Padded columns carry bias -1e30 -> exp() == 0, so max / lse are exact
    # for the real 10 classes.
    logits = jnp.dot(h3_ref[...], w4_ref[...],
                     preferred_element_type=jnp.float32) + b4_ref[...]
    m = jnp.max(logits, axis=1, keepdims=True)
    shifted = logits - m
    lse = jnp.log(jnp.sum(jnp.exp(shifted), axis=1, keepdims=True))
    o_ref[...] = (shifted - lse).astype(o_ref.dtype)


def classifier_sexp(x_img, params, *, tile_b_cap=2048):
    """x_img: (N, 1, 28, 28) float32 NCHW. Returns (N, 10) float32 log-probs."""
    n = x_img.shape[0]

    (w1, b1, w2, b2, w3, b3, w4, b4, alphas) = params

    # ---- host-side prep (single bf16 pass over the input) -------------------
    x = x_img.reshape(n, -1).astype(jnp.bfloat16)        # (N, 784), matches x.view(N, -1)
    in_features = x.shape[1]

    # Lane-dense output: pad fc4 to 128 output lanes.  Zero weight columns and
    # a -1e30 bias make the padded logits contribute exp(.) == 0.
    out_pad = 128
    n_classes = w4.shape[1]
    w4p = jnp.zeros((w4.shape[0], out_pad), jnp.float32).at[:, :n_classes].set(w4)
    b4p = jnp.full((out_pad,), -1e30, jnp.float32).at[:n_classes].set(b4)

    # bf16 weights for the MXU (halves weight HBM traffic); f32 biases.
    w1b, w2b, w3b, w4b = (w.astype(jnp.bfloat16) for w in (w1, w2, w3, w4p))
    b1r, b2r, b3r, b4r = (b.reshape(1, -1).astype(jnp.float32)
                          for b in (b1, b2, b3, b4p))

    # ---- batch tiling --------------------------------------------------------
    # Pick the number of tiles first (minimizes pad waste for awkward n), then
    # derive an 8-aligned tile.  Keep >= 2 (even when possible) grid steps for
    # large batches so v7x megacore can split the "parallel" axis; at
    # tile_b=2048 the per-step VMEM working set (~11 MiB incl. double buffers)
    # still fits the 16 MiB v5e scoped default.
    n8 = _round_up(n, 8)
    num_tiles = max(1, math.ceil(n / tile_b_cap))
    if num_tiles == 1 and n8 >= 1024:
        num_tiles = 2
    elif num_tiles > 2 and num_tiles % 2:
        num_tiles += 1
    tile_b = _round_up(math.ceil(n / num_tiles), 8)
    padded_n = _round_up(n, tile_b)
    if padded_n != n:
        x = jnp.pad(x, ((0, padded_n - n), (0, 0)))      # padded rows sliced off below

    grid = (padded_n // tile_b,)

    def const_spec(shape):
        # Same block every grid step -> weights/biases DMA'd once, stay resident.
        return pl.BlockSpec(shape, lambda i: (0, 0))

    out = pl.pallas_call(
        classifier_sexp_kernel,
        out_shape=jax.ShapeDtypeStruct((padded_n, out_pad), jnp.float32),
        grid=grid,
        in_specs=[
            pl.BlockSpec(memory_space=pltpu.MemorySpace.SMEM),        # alphas
            pl.BlockSpec((tile_b, in_features), lambda i: (i, 0)),    # x tile
            const_spec(w1b.shape), const_spec(b1r.shape),
            const_spec(w2b.shape), const_spec(b2r.shape),
            const_spec(w3b.shape), const_spec(b3r.shape),
            const_spec(w4b.shape), const_spec(b4r.shape),
        ],
        out_specs=pl.BlockSpec((tile_b, out_pad), lambda i: (i, 0)),
        scratch_shapes=[
            pltpu.VMEM((tile_b, 256), jnp.bfloat16),
            pltpu.VMEM((tile_b, 128), jnp.bfloat16),
            pltpu.VMEM((tile_b, 64), jnp.bfloat16),
        ],
        compiler_params=pltpu.CompilerParams(
            dimension_semantics=("parallel",)),           # megacore on v7x
    )(alphas, x,
      w1b, b1r, w2b, b2r, w3b, b3r, w4b, b4r)

    return out[:n, :n_classes]


def classifier_sexp_reference(x_img, params):
    """Pure-JAX reference (same bf16-matmul / f32-accumulate recipe)."""
    (w1, b1, w2, b2, w3, b3, w4, b4, alphas) = params
    x = x_img.reshape(x_img.shape[0], -1).astype(jnp.float32)

    def dot_bf16(u, w):
        return jnp.dot(u.astype(jnp.bfloat16), w.astype(jnp.bfloat16),
                       preferred_element_type=jnp.float32)

    def sexp(v, a):
        safe = jnp.where(a == 0.0, 1.0, a)
        neg = -jnp.log(1.0 - a * (v + a)) / safe
        pos = (jnp.exp(a * v) - 1.0) / safe + a
        return jnp.where(a == 0.0, v, jnp.where(a < 0.0, neg, pos))

    h = sexp(dot_bf16(x, w1) + b1, alphas[0])
    h = sexp(dot_bf16(h, w2) + b2, alphas[1])
    h = sexp(dot_bf16(h, w3) + b3, alphas[2])
    logits = dot_bf16(h, w4) + b4
    return jax.nn.log_softmax(logits, axis=1)


def init_params(key):
    """nn.Linear-style U(-1/sqrt(fan_in), 1/sqrt(fan_in)) init; alpha = 0.0."""
    dims = [(784, 256), (256, 128), (128, 64), (64, 10)]
    params = []
    keys = jax.random.split(key, 2 * len(dims))
    for i, (fin, fout) in enumerate(dims):
        bound = 1.0 / jnp.sqrt(fin)
        w = jax.random.uniform(keys[2 * i], (fin, fout), jnp.float32, -bound, bound)
        b = jax.random.uniform(keys[2 * i + 1], (fout,), jnp.float32, -bound, bound)
        params.extend([w, b])
    params.append(jnp.zeros((3,), jnp.float32))   # a1, a2, a3 default alpha = 0.0
    return tuple(params)


if __name__ == "__main__":
    key = jax.random.PRNGKey(0)
    pkey, xkey = jax.random.split(key)
    params = init_params(pkey)

    # MNIST-like NCHW input implied by fc1's 784 = 1*28*28 input features.
    x = jax.random.normal(xkey, (8, 1, 28, 28), jnp.float32)

    # 1) default alphas (all zero -> identity activations, no EUP work at runtime)
    out = jax.block_until_ready(classifier_sexp(x, params))
    ref = classifier_sexp_reference(x, params)
    assert out.shape == (8, 10)
    assert bool(jnp.allclose(jnp.sum(jnp.exp(out), axis=1), 1.0, atol=1e-4))
    assert bool(jnp.allclose(out, ref, atol=1e-2))

    # 2) exercise the positive / negative / zero alpha branches
    params2 = params[:-1] + (jnp.array([0.5, -0.1, 0.25], jnp.float32),)
    out2 = jax.block_until_ready(classifier_sexp(x, params2))
    ref2 = classifier_sexp_reference(x, params2)
    assert bool(jnp.all(jnp.isfinite(out2)))
    assert bool(jnp.allclose(jnp.sum(jnp.exp(out2), axis=1), 1.0, atol=1e-4))
    assert bool(jnp.allclose(out2, ref2, atol=1e-2))

    # 3) a larger, non-multiple batch to exercise tiling / padding / slicing
    x3 = jax.random.normal(jax.random.PRNGKey(3), (37, 1, 28, 28), jnp.float32)
    out3 = jax.block_until_ready(classifier_sexp(x3, params2))
    ref3 = classifier_sexp_reference(x3, params2)
    assert out3.shape == (37, 10)
    assert bool(jnp.allclose(out3, ref3, atol=1e-2))

    print("KERNEL_OK")
</pallas_src>

<mosaic_0001>
module attributes {stable_mosaic.version = 11 : i64} {
  func.func @classifier_sexp_kernel(%arg0: i32, %arg1: memref<3xf32, #tpu.memory_space<smem>>, %arg2: memref<8x784xbf16, #tpu.memory_space<vmem>>, %arg3: memref<784x256xbf16, #tpu.memory_space<vmem>>, %arg4: memref<1x256xf32, #tpu.memory_space<vmem>>, %arg5: memref<256x128xbf16, #tpu.memory_space<vmem>>, %arg6: memref<1x128xf32, #tpu.memory_space<vmem>>, %arg7: memref<128x64xbf16, #tpu.memory_space<vmem>>, %arg8: memref<1x64xf32, #tpu.memory_space<vmem>>, %arg9: memref<64x128xbf16, #tpu.memory_space<vmem>>, %arg10: memref<1x128xf32, #tpu.memory_space<vmem>>, %arg11: memref<8x128xf32, #tpu.memory_space<vmem>>, %arg12: memref<8x256xbf16, #tpu.memory_space<vmem>>, %arg13: memref<8x128xbf16, #tpu.memory_space<vmem>>, %arg14: memref<8x64xbf16, #tpu.memory_space<vmem>>) attributes {dimension_semantics = [#tpu.dimension_semantics<parallel>], iteration_bounds = array<i64: 1>, scalar_prefetch = 0 : i64, scratch_operands = 3 : i64, tpu.core_type = #tpu.core_type<tc>, window_params = [{transform_indices = @transform_0, window_bounds = array<i64: 3>}, {transform_indices = @transform_1, window_bounds = array<i64: 8, 784>}, {pipeline_mode = #tpu.pipeline_mode<synchronous>, transform_indices = @transform_2, window_bounds = array<i64: 784, 256>}, {pipeline_mode = #tpu.pipeline_mode<synchronous>, transform_indices = @transform_3, window_bounds = array<i64: 1, 256>}, {pipeline_mode = #tpu.pipeline_mode<synchronous>, transform_indices = @transform_4, window_bounds = array<i64: 256, 128>}, {pipeline_mode = #tpu.pipeline_mode<synchronous>, transform_indices = @transform_5, window_bounds = array<i64: 1, 128>}, {pipeline_mode = #tpu.pipeline_mode<synchronous>, transform_indices = @transform_6, window_bounds = array<i64: 128, 64>}, {pipeline_mode = #tpu.pipeline_mode<synchronous>, transform_indices = @transform_7, window_bounds = array<i64: 1, 64>}, {pipeline_mode = #tpu.pipeline_mode<synchronous>, transform_indices = @transform_8, window_bounds = array<i64: 64, 128>}, {pipeline_mode = #tpu.pipeline_mode<synchronous>, transform_indices = @transform_9, window_bounds = array<i64: 1, 128>}, {transform_indices = @transform_10, window_bounds = array<i64: 8, 128>}]} {
    %c0 = arith.constant 0 : index
    %0 = memref.load %arg1[%c0] : memref<3xf32, #tpu.memory_space<smem>>
    %c1 = arith.constant 1 : index
    %1 = memref.load %arg1[%c1] : memref<3xf32, #tpu.memory_space<smem>>
    %c2 = arith.constant 2 : index
    %2 = memref.load %arg1[%c2] : memref<3xf32, #tpu.memory_space<smem>>
    %c0_0 = arith.constant 0 : index
    %c0_1 = arith.constant 0 : index
    %3 = vector.load %arg2[%c0_0, %c0_1] : memref<8x784xbf16, #tpu.memory_space<vmem>>, vector<8x784xbf16>
    %c0_2 = arith.constant 0 : index
    %c0_3 = arith.constant 0 : index
    %4 = vector.load %arg3[%c0_2, %c0_3] : memref<784x256xbf16, #tpu.memory_space<vmem>>, vector<784x256xbf16>
    %cst = arith.constant dense<0.000000e+00> : vector<8x256xf32>
    %5 = tpu.matmul %3, %4, %cst {dimension_numbers = #tpu.dot_dimension_numbers<[1], [0], [0], [1], [0, 0, 1, 1], [], []>} : vector<8x784xbf16>, vector<784x256xbf16>, vector<8x256xf32> -> vector<8x256xf32>
    %c0_4 = arith.constant 0 : index
    %c0_5 = arith.constant 0 : index
    %6 = vector.load %arg4[%c0_4, %c0_5] : memref<1x256xf32, #tpu.memory_space<vmem>>, vector<1x256xf32>
    %7 = vector.broadcast %6 : vector<1x256xf32> to vector<8x256xf32>
    %8 = arith.addf %5, %7 : vector<8x256xf32>
    %cst_6 = arith.constant 0.000000e+00 : f32
    %9 = arith.cmpf oeq, %0, %cst_6 : f32
    %10 = arith.extui %9 : i1 to i32
    %c0_i32 = arith.constant 0 : i32
    %11 = arith.cmpi ne, %10, %c0_i32 : i32
    scf.if %11 {
      %65 = arith.truncf %8 : vector<8x256xf32> to vector<8x256xbf16>
      %c0_48 = arith.constant 0 : index
      %c0_49 = arith.constant 0 : index
      %66 = vector.load %arg12[%c0_48, %c0_49] : memref<8x256xbf16, #tpu.memory_space<vmem>>, vector<8x256xbf16>
      tpu.vector_store %arg12[%c0_48, %c0_49], %65 {strides = array<i32>} : memref<8x256xbf16, #tpu.memory_space<vmem>>, vector<8x256xbf16>,
    } else {
    }
    %cst_7 = arith.constant 0.000000e+00 : f32
    %12 = arith.cmpf olt, %0, %cst_7 : f32
    %13 = arith.extui %12 : i1 to i32
    %c0_i32_8 = arith.constant 0 : i32
    %14 = arith.cmpi ne, %13, %c0_i32_8 : i32
    scf.if %14 {
      %65 = vector.broadcast %0 : f32 to vector<8x256xf32>
      %66 = arith.addf %8, %65 : vector<8x256xf32>
      %67 = vector.broadcast %0 : f32 to vector<8x256xf32>
      %68 = arith.mulf %67, %66 : vector<8x256xf32>
      %cst_48 = arith.constant 1.000000e+00 : f32
      %69 = vector.broadcast %cst_48 : f32 to vector<8x256xf32>
      %70 = arith.subf %69, %68 : vector<8x256xf32>
      %71 = math.log %70 : vector<8x256xf32>
      %cst_49 = arith.constant 0.000000e+00 : f32
      %72 = vector.broadcast %cst_49 : f32 to vector<8x256xf32>
      %73 = arith.subf %72, %71 : vector<8x256xf32>
      %74 = vector.broadcast %0 : f32 to vector<8x256xf32>
      %75 = arith.divf %73, %74 : vector<8x256xf32>
      %76 = arith.truncf %75 : vector<8x256xf32> to vector<8x256xbf16>
      %c0_50 = arith.constant 0 : index
      %c0_51 = arith.constant 0 : index
      %77 = vector.load %arg12[%c0_50, %c0_51] : memref<8x256xbf16, #tpu.memory_space<vmem>>, vector<8x256xbf16>
      tpu.vector_store %arg12[%c0_50, %c0_51], %76 {strides = array<i32>} : memref<8x256xbf16, #tpu.memory_space<vmem>>, vector<8x256xbf16>,
    } else {
    }
    %cst_9 = arith.constant 0.000000e+00 : f32
    %15 = arith.cmpf ogt, %0, %cst_9 : f32
    %16 = arith.extui %15 : i1 to i32
    %c0_i32_10 = arith.constant 0 : i32
    %17 = arith.cmpi ne, %16, %c0_i32_10 : i32
    scf.if %17 {
      %65 = vector.broadcast %0 : f32 to vector<8x256xf32>
      %66 = arith.mulf %65, %8 : vector<8x256xf32>
      %67 = math.exp %66 : vector<8x256xf32>
      %cst_48 = arith.constant 1.000000e+00 : f32
      %68 = vector.broadcast %cst_48 : f32 to vector<8x256xf32>
      %69 = arith.subf %67, %68 : vector<8x256xf32>
      %70 = vector.broadcast %0 : f32 to vector<8x256xf32>
      %71 = arith.divf %69, %70 : vector<8x256xf32>
      %72 = vector.broadcast %0 : f32 to vector<8x256xf32>
      %73 = arith.addf %71, %72 : vector<8x256xf32>
      %74 = arith.truncf %73 : vector<8x256xf32> to vector<8x256xbf16>
      %c0_49 = arith.constant 0 : index
      %c0_50 = arith.constant 0 : index
      %75 = vector.load %arg12[%c0_49, %c0_50] : memref<8x256xbf16, #tpu.memory_space<vmem>>, vector<8x256xbf16>
      tpu.vector_store %arg12[%c0_49, %c0_50], %74 {strides = array<i32>} : memref<8x256xbf16, #tpu.memory_space<vmem>>, vector<8x256xbf16>,
    } else {
    }
    %c0_11 = arith.constant 0 : index
    %c0_12 = arith.constant 0 : index
    %18 = vector.load %arg12[%c0_11, %c0_12] : memref<8x256xbf16, #tpu.memory_space<vmem>>, vector<8x256xbf16>
    %c0_13 = arith.constant 0 : index
    %c0_14 = arith.constant 0 : index
    %19 = vector.load %arg5[%c0_13, %c0_14] : memref<256x128xbf16, #tpu.memory_space<vmem>>, vector<256x128xbf16>
    %cst_15 = arith.constant dense<0.000000e+00> : vector<8x128xf32>
    %20 = tpu.matmul %18, %19, %cst_15 {dimension_numbers = #tpu.dot_dimension_numbers<[1], [0], [0], [1], [0, 0, 1, 1], [], []>} : vector<8x256xbf16>, vector<256x128xbf16>, vector<8x128xf32> -> vector<8x128xf32>
    %c0_16 = arith.constant 0 : index
    %c0_17 = arith.constant 0 : index
    %21 = vector.load %arg6[%c0_16, %c0_17] : memref<1x128xf32, #tpu.memory_space<vmem>>, vector<1x128xf32>
    %22 = vector.broadcast %21 : vector<1x128xf32> to vector<8x128xf32>
    %23 = arith.addf %20, %22 : vector<8x128xf32>
    %cst_18 = arith.constant 0.000000e+00 : f32
    %24 = arith.cmpf oeq, %1, %cst_18 : f32
    %25 = arith.extui %24 : i1 to i32
    %c0_i32_19 = arith.constant 0 : i32
    %26 = arith.cmpi ne, %25, %c0_i32_19 : i32
    scf.if %26 {
      %65 = arith.truncf %23 : vector<8x128xf32> to vector<8x128xbf16>
      %c0_48 = arith.constant 0 : index
      %c0_49 = arith.constant 0 : index
      %66 = vector.load %arg13[%c0_48, %c0_49] : memref<8x128xbf16, #tpu.memory_space<vmem>>, vector<8x128xbf16>
      tpu.vector_store %arg13[%c0_48, %c0_49], %65 {strides = array<i32>} : memref<8x128xbf16, #tpu.memory_space<vmem>>, vector<8x128xbf16>,
    } else {
    }
    %cst_20 = arith.constant 0.000000e+00 : f32
    %27 = arith.cmpf olt, %1, %cst_20 : f32
    %28 = arith.extui %27 : i1 to i32
    %c0_i32_21 = arith.constant 0 : i32
    %29 = arith.cmpi ne, %28, %c0_i32_21 : i32
    scf.if %29 {
      %65 = vector.broadcast %1 : f32 to vector<8x128xf32>
      %66 = arith.addf %23, %65 : vector<8x128xf32>
      %67 = vector.broadcast %1 : f32 to vector<8x128xf32>
      %68 = arith.mulf %67, %66 : vector<8x128xf32>
      %cst_48 = arith.constant 1.000000e+00 : f32
      %69 = vector.broadcast %cst_48 : f32 to vector<8x128xf32>
      %70 = arith.subf %69, %68 : vector<8x128xf32>
      %71 = math.log %70 : vector<8x128xf32>
      %cst_49 = arith.constant 0.000000e+00 : f32
      %72 = vector.broadcast %cst_49 : f32 to vector<8x128xf32>
      %73 = arith.subf %72, %71 : vector<8x128xf32>
      %74 = vector.broadcast %1 : f32 to vector<8x128xf32>
      %75 = arith.divf %73, %74 : vector<8x128xf32>
      %76 = arith.truncf %75 : vector<8x128xf32> to vector<8x128xbf16>
      %c0_50 = arith.constant 0 : index
      %c0_51 = arith.constant 0 : index
      %77 = vector.load %arg13[%c0_50, %c0_51] : memref<8x128xbf16, #tpu.memory_space<vmem>>, vector<8x128xbf16>
      tpu.vector_store %arg13[%c0_50, %c0_51], %76 {strides = array<i32>} : memref<8x128xbf16, #tpu.memory_space<vmem>>, vector<8x128xbf16>,
    } else {
    }
    %cst_22 = arith.constant 0.000000e+00 : f32
    %30 = arith.cmpf ogt, %1, %cst_22 : f32
    %31 = arith.extui %30 : i1 to i32
    %c0_i32_23 = arith.constant 0 : i32
    %32 = arith.cmpi ne, %31, %c0_i32_23 : i32
    scf.if %32 {
      %65 = vector.broadcast %1 : f32 to vector<8x128xf32>
      %66 = arith.mulf %65, %23 : vector<8x128xf32>
      %67 = math.exp %66 : vector<8x128xf32>
      %cst_48 = arith.constant 1.000000e+00 : f32
      %68 = vector.broadcast %cst_48 : f32 to vector<8x128xf32>
      %69 = arith.subf %67, %68 : vector<8x128xf32>
      %70 = vector.broadcast %1 : f32 to vector<8x128xf32>
      %71 = arith.divf %69, %70 : vector<8x128xf32>
      %72 = vector.broadcast %1 : f32 to vector<8x128xf32>
      %73 = arith.addf %71, %72 : vector<8x128xf32>
      %74 = arith.truncf %73 : vector<8x128xf32> to vector<8x128xbf16>
      %c0_49 = arith.constant 0 : index
      %c0_50 = arith.constant 0 : index
      %75 = vector.load %arg13[%c0_49, %c0_50] : memref<8x128xbf16, #tpu.memory_space<vmem>>, vector<8x128xbf16>
      tpu.vector_store %arg13[%c0_49, %c0_50], %74 {strides = array<i32>} : memref<8x128xbf16, #tpu.memory_space<vmem>>, vector<8x128xbf16>,
    } else {
    }
    %c0_24 = arith.constant 0 : index
    %c0_25 = arith.constant 0 : index
    %33 = vector.load %arg13[%c0_24, %c0_25] : memref<8x128xbf16, #tpu.memory_space<vmem>>, vector<8x128xbf16>
    %c0_26 = arith.constant 0 : index
    %c0_27 = arith.constant 0 : index
    %34 = vector.load %arg7[%c0_26, %c0_27] : memref<128x64xbf16, #tpu.memory_space<vmem>>, vector<128x64xbf16>
    %cst_28 = arith.constant dense<0.000000e+00> : vector<8x64xf32>
    %35 = tpu.matmul %33, %34, %cst_28 {dimension_numbers = #tpu.dot_dimension_numbers<[1], [0], [0], [1], [0, 0, 1, 1], [], []>} : vector<8x128xbf16>, vector<128x64xbf16>, vector<8x64xf32> -> vector<8x64xf32>
    %c0_29 = arith.constant 0 : index
    %c0_30 = arith.constant 0 : index
    %36 = vector.load %arg8[%c0_29, %c0_30] : memref<1x64xf32, #tpu.memory_space<vmem>>, vector<1x64xf32>
    %37 = vector.broadcast %36 : vector<1x64xf32> to vector<8x64xf32>
    %38 = arith.addf %35, %37 : vector<8x64xf32>
    %cst_31 = arith.constant 0.000000e+00 : f32
    %39 = arith.cmpf oeq, %2, %cst_31 : f32
    %40 = arith.extui %39 : i1 to i32
    %c0_i32_32 = arith.constant 0 : i32
    %41 = arith.cmpi ne, %40, %c0_i32_32 : i32
    scf.if %41 {
      %65 = arith.truncf %38 : vector<8x64xf32> to vector<8x64xbf16>
      %c0_48 = arith.constant 0 : index
      %c0_49 = arith.constant 0 : index
      %66 = vector.load %arg14[%c0_48, %c0_49] : memref<8x64xbf16, #tpu.memory_space<vmem>>, vector<8x64xbf16>
      tpu.vector_store %arg14[%c0_48, %c0_49], %65 {strides = array<i32>} : memref<8x64xbf16, #tpu.memory_space<vmem>>, vector<8x64xbf16>,
    } else {
    }
    %cst_33 = arith.constant 0.000000e+00 : f32
    %42 = arith.cmpf olt, %2, %cst_33 : f32
    %43 = arith.extui %42 : i1 to i32
    %c0_i32_34 = arith.constant 0 : i32
    %44 = arith.cmpi ne, %43, %c0_i32_34 : i32
    scf.if %44 {
      %65 = vector.broadcast %2 : f32 to vector<8x64xf32>
      %66 = arith.addf %38, %65 : vector<8x64xf32>
      %67 = vector.broadcast %2 : f32 to vector<8x64xf32>
      %68 = arith.mulf %67, %66 : vector<8x64xf32>
      %cst_48 = arith.constant 1.000000e+00 : f32
      %69 = vector.broadcast %cst_48 : f32 to vector<8x64xf32>
      %70 = arith.subf %69, %68 : vector<8x64xf32>
      %71 = math.log %70 : vector<8x64xf32>
      %cst_49 = arith.constant 0.000000e+00 : f32
      %72 = vector.broadcast %cst_49 : f32 to vector<8x64xf32>
      %73 = arith.subf %72, %71 : vector<8x64xf32>
      %74 = vector.broadcast %2 : f32 to vector<8x64xf32>
      %75 = arith.divf %73, %74 : vector<8x64xf32>
      %76 = arith.truncf %75 : vector<8x64xf32> to vector<8x64xbf16>
      %c0_50 = arith.constant 0 : index
      %c0_51 = arith.constant 0 : index
      %77 = vector.load %arg14[%c0_50, %c0_51] : memref<8x64xbf16, #tpu.memory_space<vmem>>, vector<8x64xbf16>
      tpu.vector_store %arg14[%c0_50, %c0_51], %76 {strides = array<i32>} : memref<8x64xbf16, #tpu.memory_space<vmem>>, vector<8x64xbf16>,
    } else {
    }
    %cst_35 = arith.constant 0.000000e+00 : f32
    %45 = arith.cmpf ogt, %2, %cst_35 : f32
    %46 = arith.extui %45 : i1 to i32
    %c0_i32_36 = arith.constant 0 : i32
    %47 = arith.cmpi ne, %46, %c0_i32_36 : i32
    scf.if %47 {
      %65 = vector.broadcast %2 : f32 to vector<8x64xf32>
      %66 = arith.mulf %65, %38 : vector<8x64xf32>
      %67 = math.exp %66 : vector<8x64xf32>
      %cst_48 = arith.constant 1.000000e+00 : f32
      %68 = vector.broadcast %cst_48 : f32 to vector<8x64xf32>
      %69 = arith.subf %67, %68 : vector<8x64xf32>
      %70 = vector.broadcast %2 : f32 to vector<8x64xf32>
      %71 = arith.divf %69, %70 : vector<8x64xf32>
      %72 = vector.broadcast %2 : f32 to vector<8x64xf32>
      %73 = arith.addf %71, %72 : vector<8x64xf32>
      %74 = arith.truncf %73 : vector<8x64xf32> to vector<8x64xbf16>
      %c0_49 = arith.constant 0 : index
      %c0_50 = arith.constant 0 : index
      %75 = vector.load %arg14[%c0_49, %c0_50] : memref<8x64xbf16, #tpu.memory_space<vmem>>, vector<8x64xbf16>
      tpu.vector_store %arg14[%c0_49, %c0_50], %74 {strides = array<i32>} : memref<8x64xbf16, #tpu.memory_space<vmem>>, vector<8x64xbf16>,
    } else {
    }
    %c0_37 = arith.constant 0 : index
    %c0_38 = arith.constant 0 : index
    %48 = vector.load %arg14[%c0_37, %c0_38] : memref<8x64xbf16, #tpu.memory_space<vmem>>, vector<8x64xbf16>
    %c0_39 = arith.constant 0 : index
    %c0_40 = arith.constant 0 : index
    %49 = vector.load %arg9[%c0_39, %c0_40] : memref<64x128xbf16, #tpu.memory_space<vmem>>, vector<64x128xbf16>
    %cst_41 = arith.constant dense<0.000000e+00> : vector<8x128xf32>
    %50 = tpu.matmul %48, %49, %cst_41 {dimension_numbers = #tpu.dot_dimension_numbers<[1], [0], [0], [1], [0, 0, 1, 1], [], []>} : vector<8x64xbf16>, vector<64x128xbf16>, vector<8x128xf32> -> vector<8x128xf32>
    %c0_42 = arith.constant 0 : index
    %c0_43 = arith.constant 0 : index
    %51 = vector.load %arg10[%c0_42, %c0_43] : memref<1x128xf32, #tpu.memory_space<vmem>>, vector<1x128xf32>
    %52 = vector.broadcast %51 : vector<1x128xf32> to vector<8x128xf32>
    %53 = arith.addf %50, %52 : vector<8x128xf32>
    %cst_44 = arith.constant dense<0xFF800000> : vector<8xf32>
    %54 = vector.multi_reduction <maximumf>, %53, %cst_44 [1] : vector<8x128xf32> to vector<8xf32>
    %55 = vector.shape_cast %54 : vector<8xf32> to vector<8x1xf32>
    %56 = vector.broadcast %55 : vector<8x1xf32> to vector<8x128xf32>
    %57 = arith.subf %53, %56 : vector<8x128xf32>
    %58 = math.exp %57 : vector<8x128xf32>
    %cst_45 = arith.constant dense<0.000000e+00> : vector<8xf32>
    %59 = vector.multi_reduction <add>, %58, %cst_45 [1] : vector<8x128xf32> to vector<8xf32>
    %60 = vector.shape_cast %59 : vector<8xf32> to vector<8x1xf32>
    %61 = math.log %60 : vector<8x1xf32>
    %62 = vector.broadcast %61 : vector<8x1xf32> to vector<8x128xf32>
    %63 = arith.subf %57, %62 : vector<8x128xf32>
    %c0_46 = arith.constant 0 : index
    %c0_47 = arith.constant 0 : index
    %64 = vector.load %arg11[%c0_46, %c0_47] : memref<8x128xf32, #tpu.memory_space<vmem>>, vector<8x128xf32>
    tpu.vector_store %arg11[%c0_46, %c0_47], %63 {strides = array<i32>} : memref<8x128xf32, #tpu.memory_space<vmem>>, vector<8x128xf32>,
    return
  }
  func.func @transform_0(%arg0: i32) -> i32 {
    %c0_i32 = arith.constant 0 : i32
    %c0_i32_0 = arith.constant 0 : i32
    return %c0_i32 : i32
  }
  func.func @transform_1(%arg0: i32) -> (i32, i32) {
    %c0_i32 = arith.constant 0 : i32
    %c0_i32_0 = arith.constant 0 : i32
    return %arg0, %c0_i32 : i32, i32
  }
  func.func @transform_2(%arg0: i32) -> (i32, i32) {
    %c0_i32 = arith.constant 0 : i32
    %c0_i32_0 = arith.constant 0 : i32
    %c0_i32_1 = arith.constant 0 : i32
    return %c0_i32, %c0_i32_0 : i32, i32
  }
  func.func @transform_3(%arg0: i32) -> (i32, i32) {
    %c0_i32 = arith.constant 0 : i32
    %c0_i32_0 = arith.constant 0 : i32
    %c0_i32_1 = arith.constant 0 : i32
    return %c0_i32, %c0_i32_0 : i32, i32
  }
  func.func @transform_4(%arg0: i32) -> (i32, i32) {
    %c0_i32 = arith.constant 0 : i32
    %c0_i32_0 = arith.constant 0 : i32
    %c0_i32_1 = arith.constant 0 : i32
    return %c0_i32, %c0_i32_0 : i32, i32
  }
  func.func @transform_5(%arg0: i32) -> (i32, i32) {
    %c0_i32 = arith.constant 0 : i32
    %c0_i32_0 = arith.constant 0 : i32
    %c0_i32_1 = arith.constant 0 : i32
    return %c0_i32, %c0_i32_0 : i32, i32
  }
  func.func @transform_6(%arg0: i32) -> (i32, i32) {
    %c0_i32 = arith.constant 0 : i32
    %c0_i32_0 = arith.constant 0 : i32
    %c0_i32_1 = arith.constant 0 : i32
    return %c0_i32, %c0_i32_0 : i32, i32
  }
  func.func @transform_7(%arg0: i32) -> (i32, i32) {
    %c0_i32 = arith.constant 0 : i32
    %c0_i32_0 = arith.constant 0 : i32
    %c0_i32_1 = arith.constant 0 : i32
    return %c0_i32, %c0_i32_0 : i32, i32
  }
  func.func @transform_8(%arg0: i32) -> (i32, i32) {
    %c0_i32 = arith.constant 0 : i32
    %c0_i32_0 = arith.constant 0 : i32
    %c0_i32_1 = arith.constant 0 : i32
    return %c0_i32, %c0_i32_0 : i32, i32
  }
  func.func @transform_9(%arg0: i32) -> (i32, i32) {
    %c0_i32 = arith.constant 0 : i32
    %c0_i32_0 = arith.constant 0 : i32
    %c0_i32_1 = arith.constant 0 : i32
    return %c0_i32, %c0_i32_0 : i32, i32
  }
  func.func @transform_10(%arg0: i32) -> (i32, i32) {
    %c0_i32 = arith.constant 0 : i32
    %c0_i32_0 = arith.constant 0 : i32
    return %arg0, %c0_i32 : i32, i32
  }
}

</mosaic_0001>

<bundles_post_ra>
// kernel: tpu_custom_call.1
= control target key start
LH: loop header
LB: loop body
LE: loop exit
PB: predicated region body
PF: predicated region fallthrough
CT: control target
= control target key end

     0   :  { %15 = vsyncpa [#allocation8], 0  ;;  %s2187_s0 = inlined_call_operand.vmem [shape: f32[3], index: 0, kind: input, shape index: {}]   ;;  %s2188_s1 = inlined_call_operand.vmem [shape: bf16[8,784], index: 1, kind: input, shape index: {}]   ;;  %s2189_s2 = inlined_call_operand.hbm [shape: bf16[784,256], index: 2, kind: input, shape index: {}]   ;;  %s2190_s3 = inlined_call_operand.vmem [shape: f32[1,256], index: 3, kind: input, shape index: {}]   ;;  %s2191_s4 = inlined_call_operand.hbm [shape: bf16[256,128], index: 4, kind: input, shape index: {}]   ;;  %s2192_s5 = inlined_call_operand.vmem [shape: f32[1,128], index: 5, kind: input, shape index: {}]   ;;  %s2193_s6 = inlined_call_operand.vmem [shape: bf16[128,64], index: 6, kind: input, shape index: {}]   ;;  %s2194_s7 = inlined_call_operand.vmem [shape: f32[1,64], index: 7, kind: input, shape index: {}]   ;;  %s2195_s8 = inlined_call_operand.vmem [shape: bf16[64,128], index: 8, kind: input, shape index: {}]   ;;  %s2196_s9 = inlined_call_operand.vmem [shape: f32[1,128], index: 9, kind: input, shape index: {}]   ;;  %s2197_s10 = inlined_call_operand.hbm [shape: f32[8,128], index: 10, kind: output, shape index: {}]  }
   0x1   :  { %16 = vsyncpa [#allocation6], 0 }
   0x2   :  { %17 = vsyncpa [#allocation11], 0 }
   0x3   :  { %18 = vsyncpa [#allocation7], 0  ;;  %s25_s15 = sshll.u32 %s2187_s0, 4  ;;  %s26_s15 = int_to_ptr.vmem [resolvable:$true] %s25_s15 }
   0x4   :  { %s1885_s16 = scalar_lea.vmem %s26_s15, 16  ;;  %p1890_p1 = scmp.lt.s32.totalorder %s26_s15, %s26_s15 }
   0x5   :  { %p1886_p0 = scmp.ne.s32.totalorder %s26_s15, %s1885_s16  ;;  %p1891_p2 = scmp.lt.s32.totalorder %s1885_s16, %s1885_s16 }
   0x7   :  { %p1892_p3 = por %p1891_p2, %p1890_p1 }
   0x9   :  { %p1893_p4 = pnand %p1892_p3, %p1886_p0 }
   0xb   :  { %1896 = shalt.err (!%p1893_p4)
}
   0xc   :  { %s1971_s17 = smov [#allocation5]   ;;  %s1972_s18 = smov [#allocation9]  }
   0xd   :  { %28 = dma.vmem_to_smem %s26_s15, 16, %s1971_s17, [#allocation8]  }
   0xe   :  { %s36_s19 = sshll.u32 %s1972_s18, 4  ;;  %s1897_s22 = scalar_lea.hbm %s2189_s2, 12544  ;;  %s37_s19 = int_to_ptr.vmem [resolvable:$true] %s36_s19 }
   0xf   :  { %p1898_p5 = scmp.ne.s32.totalorder %s2189_s2, %s1897_s22  ;;  %p1901_p6 = scmp.lt.u32.totalorder %s1897_s22, %s2189_s2 }
  0x11   :  { %p1903_p7 = pnand %p1901_p6, %p1898_p5 }
  0x13   :  { %1906 = shalt.err (!%p1903_p7)
}
  0x14   :  { %s1907_s26 = scalar_lea.vmem %s37_s19, 12544  ;;  %p1912_p9 = scmp.lt.s32.totalorder %s37_s19, %s37_s19 }
  0x15   :  { %p1908_p8 = scmp.ne.s32.totalorder %s37_s19, %s1907_s26  ;;  %p1913_p10 = scmp.lt.s32.totalorder %s1907_s26, %s1907_s26 }
  0x17   :  { %p1914_p11 = por %p1913_p10, %p1912_p9 }
  0x19   :  { %p1915_p12 = pnand %p1914_p11, %p1908_p8 }
  0x1b   :  { %1918 = shalt.err (!%p1915_p12)
}
  0x1c   :  { %s1973_s27 = smov 128   ;;  %s1974_s28 = smov 8  }
  0x1d   :  { %42 = dma.hbm_to_vmem [thread:$0]  %s2189_s2, 12544, %s37_s19, [#allocation6], %s1973_s27, %s1973_s27, %s1974_s28  }
  0x1e   :  { %s1975_s11 = smov [#allocation10]   ;;  %s1919_s15 = scalar_lea.hbm %s2191_s4, 2048 }
  0x1f   :  { %s50_s12 = sshll.u32 %s1975_s11, 4  ;;  %p1920_p13 = scmp.ne.s32.totalorder %s2191_s4, %s1919_s15  ;;  %s51_s12 = int_to_ptr.vmem [resolvable:$true] %s50_s12 }
  0x20   :  { %p1923_p0 = scmp.lt.u32.totalorder %s1919_s15, %s2191_s4 }
  0x22   :  { %p1925_p1 = pnand %p1923_p0, %p1920_p13 }
  0x24   :  { %1928 = shalt.err (!%p1925_p1)
}
  0x25   :  { %s1929_s21 = scalar_lea.vmem %s51_s12, 2048  ;;  %p1934_p3 = scmp.lt.s32.totalorder %s51_s12, %s51_s12 }
  0x26   :  { %p1930_p2 = scmp.ne.s32.totalorder %s51_s12, %s1929_s21  ;;  %p1935_p4 = scmp.lt.s32.totalorder %s1929_s21, %s1929_s21 }
  0x28   :  { %p1936_p5 = por %p1935_p4, %p1934_p3 }
  0x2a   :  { %p1937_p6 = pnand %p1936_p5, %p1930_p2 }
  0x2c   :  { %1940 = shalt.err (!%p1937_p6)
}
  0x2d   :  { %s1976_s2 = smov 64   ;;  %s1977_s19 = smov 4  }
  0x2e   :  { %56 = dma.hbm_to_vmem [thread:$0]  %s2191_s4, 2048, %s51_s12, [#allocation11], %s1976_s2, %s1976_s2, %s1977_s19  }
  0x2f   :  { %1963 = dma.done.wait [#allocation8], 16  }
  0x30   :  { %1964 = vsyncadd [#allocation8], 4294967280 }
  0x31   :  { %1965 = dma.done.wait [#allocation6], 12544  }
  0x32   :  { %1966 = vsyncadd [#allocation6], 4294954752 }
  0x33   :  { %1967 = dma.done.wait [#allocation11], 2048  }
  0x34   :  { %1968 = vsyncadd [#allocation11], 4294965248 }
  0x35   :  { %76 = sfence }
  0x36   :  { %v1669_v0 = vld [vmem:[#allocation9 + $0x104] ss:$8 sps:$4 sm:$0xff]   ;;  %v1671_v1 = vld [vmem:[#allocation9 + $0x100] ss:$8 sps:$4 sm:$0xff]   ;;  %s2064_s24 = sld [smem:[#allocation5 + $0x1]]  ;;  %s2066_s0 = sld [smem:[#allocation5 + $0x2]] }
  0x37   :  { %754 = vmatprep.subr.bf16.mxu0 %v1669_v0  ;;  %v1672_v2 = vld [vmem:[#allocation9 + $0x114] ss:$8 sps:$4 sm:$0xff]   ;;  %v1674_v3 = vld [vmem:[#allocation9 + $0x110] ss:$8 sps:$4 sm:$0xff]   ;;  %v1675_v4 = vld [vmem:[#allocation9 + $0x124] ss:$8 sps:$4 sm:$0xff]  }
  0x38   :  { %755 = vmatpush1.bf16.msra.mxu0 %v1671_v1  ;;  %v1677_v5 = vld [vmem:[#allocation9 + $0x120] ss:$8 sps:$4 sm:$0xff]   ;;  %v1678_v6 = vld [vmem:[#allocation9 + $0x134] ss:$8 sps:$4 sm:$0xff]   ;;  %v1680_v7 = vld [vmem:[#allocation9 + $0x130] ss:$8 sps:$4 sm:$0xff]  }
  0x39   :  { %756 = vmatprep.subr.bf16.mxu0 %v1672_v2  ;;  %v1681_v8 = vld [vmem:[#allocation9 + $0x144] ss:$8 sps:$4 sm:$0xff]   ;;  %v1683_v9 = vld [vmem:[#allocation9 + $0x140] ss:$8 sps:$4 sm:$0xff]   ;;  %v1684_v10 = vld [vmem:[#allocation9 + $0x154] ss:$8 sps:$4 sm:$0xff]  }
  0x3a   :  { %v1686_v11 = vld [vmem:[#allocation9 + $0x150] ss:$8 sps:$4 sm:$0xff]   ;;  %v1687_v12 = vld [vmem:[#allocation9 + $0x164] ss:$8 sps:$4 sm:$0xff]   ;;  %v1689_v15 = vld [vmem:[#allocation9 + $0x160] ss:$8 sps:$4 sm:$0xff]  }
  0x3b   :  { %v2071_v13 = vld [vmem:[%s2188_s1 + $0x8] sm:$0xff]  ;;  %v1728_v17 = vld [vmem:[#allocation9 + $0x4] ss:$8 sps:$4 sm:$0xff]   ;;  %v1730_v18 = vld [vmem:[#allocation9] ss:$8 sps:$4 sm:$0xff]   ;;  %vm709_vm0 = vcmask 130048  }
  0x3c   :  { %757 = vmatpush1.bf16.msra.mxu0 %v1674_v3  ;;  %v1431_v14 = vcombine.high %v2071_v13, %v2071_v13  ;;  %v1690_v16 = vld [vmem:[#allocation9 + $0x174] ss:$8 sps:$4 sm:$0xff]   ;;  %v1692_v19 = vld [vmem:[#allocation9 + $0x170] ss:$8 sps:$4 sm:$0xff]   ;;  %v1693_v20 = vld [vmem:[#allocation9 + $0x184] ss:$8 sps:$4 sm:$0xff]   ;;  %713 = vmatprep.subr.bf16.mxu1 %v1728_v17  ;;  %v1430_v56 = vcombine.low %v2071_v13, %v2071_v13 }
  0x3d   :  { %758 = vmatprep.subr.bf16.mxu0 %v1675_v4  ;;  %714 = vmatpush1.bf16.msra.mxu1 %v1730_v18  ;;  %v1734_v21 = vld [vmem:[#allocation9 + $0x14] ss:$8 sps:$4 sm:$0xff]   ;;  %v1736_v22 = vld [vmem:[#allocation9 + $0x10] ss:$8 sps:$4 sm:$0xff]   ;;  %v1695_v23 = vld [vmem:[#allocation9 + $0x180] ss:$8 sps:$4 sm:$0xff]  }
  0x3e   :  { %786 = vmatprep.mubr.bf16.mxu0 %v1431_v14  ;;  %715 = vmatprep.subr.bf16.mxu1 %v1734_v21  ;;  %v1740_v24 = vld [vmem:[#allocation9 + $0x24] ss:$8 sps:$4 sm:$0xff]   ;;  %v1696_v25 = vld [vmem:[#allocation9 + $0x194] ss:$8 sps:$4 sm:$0xff]   ;;  %v1742_v26 = vld [vmem:[#allocation9 + $0x20] ss:$8 sps:$4 sm:$0xff]  }
  0x3f   :  { %v1746_v27 = vld [vmem:[#allocation9 + $0x34] ss:$8 sps:$4 sm:$0xff]   ;;  %v1698_v28 = vld [vmem:[#allocation9 + $0x190] ss:$8 sps:$4 sm:$0xff]   ;;  %v1699_v29 = vld [vmem:[#allocation9 + $0x1a4] ss:$8 sps:$4 sm:$0xff]  }
  0x40   :  { %759 = vmatpush1.bf16.msra.mxu0 %v1677_v5  ;;  %v1748_v30 = vld [vmem:[#allocation9 + $0x30] ss:$8 sps:$4 sm:$0xff]   ;;  %v1752_v31 = vld [vmem:[#allocation9 + $0x44] ss:$8 sps:$4 sm:$0xff]   ;;  %v1701_v32 = vld [vmem:[#allocation9 + $0x1a0] ss:$8 sps:$4 sm:$0xff]  }
  0x41   :  { %760 = vmatprep.subr.bf16.mxu0 %v1678_v6  ;;  %716 = vmatpush1.bf16.msra.mxu1 %v1736_v22  ;;  %v1702_v33 = vld [vmem:[#allocation9 + $0x1b4] ss:$8 sps:$4 sm:$0xff]   ;;  %v1754_v34 = vld [vmem:[#allocation9 + $0x40] ss:$8 sps:$4 sm:$0xff]   ;;  %v1704_v36 = vld [vmem:[#allocation9 + $0x1b0] ss:$8 sps:$4 sm:$0xff]  }
  0x42   :  { %717 = vmatprep.subr.bf16.mxu1 %v1740_v24  ;;  %v1758_v35 = vld [vmem:[#allocation9 + $0x54] ss:$8 sps:$4 sm:$0xff]   ;;  %v1705_v37 = vld [vmem:[#allocation9 + $0x1c4] ss:$8 sps:$4 sm:$0xff]   ;;  %v1760_v38 = vld [vmem:[#allocation9 + $0x50] ss:$8 sps:$4 sm:$0xff]  }
  0x43   :  { %v1764_v39 = vld [vmem:[#allocation9 + $0x64] ss:$8 sps:$4 sm:$0xff]   ;;  %v1707_v40 = vld [vmem:[#allocation9 + $0x1c0] ss:$8 sps:$4 sm:$0xff]   ;;  %v1708_v41 = vld [vmem:[#allocation9 + $0x1d4] ss:$8 sps:$4 sm:$0xff]  }
  0x44   :  { %761 = vmatpush1.bf16.msra.mxu0 %v1680_v7  ;;  %v1766_v42 = vld [vmem:[#allocation9 + $0x60] ss:$8 sps:$4 sm:$0xff]   ;;  %v1770_v43 = vld [vmem:[#allocation9 + $0x74] ss:$8 sps:$4 sm:$0xff]   ;;  %v1710_v44 = vld [vmem:[#allocation9 + $0x1d0] ss:$8 sps:$4 sm:$0xff]  }
  0x45   :  { %762 = vmatprep.subr.bf16.mxu0 %v1681_v8  ;;  %718 = vmatpush1.bf16.msra.mxu1 %v1742_v26  ;;  %v1711_v45 = vld [vmem:[#allocation9 + $0x1e4] ss:$8 sps:$4 sm:$0xff]   ;;  %v1772_v46 = vld [vmem:[#allocation9 + $0x70] ss:$8 sps:$4 sm:$0xff]   ;;  %v1713_v48 = vld [vmem:[#allocation9 + $0x1e0] ss:$8 sps:$4 sm:$0xff]  }
  0x46   :  { %719 = vmatprep.subr.bf16.mxu1 %v1746_v27  ;;  %v1776_v47 = vld [vmem:[#allocation9 + $0x84] ss:$8 sps:$4 sm:$0xff]   ;;  %v1714_v49 = vld [vmem:[#allocation9 + $0x1f4] ss:$8 sps:$4 sm:$0xff]   ;;  %v1778_v50 = vld [vmem:[#allocation9 + $0x80] ss:$8 sps:$4 sm:$0xff]  }
  0x47   :  { %v1782_v51 = vld [vmem:[#allocation9 + $0x94] ss:$8 sps:$4 sm:$0xff]   ;;  %v1716_v52 = vld [vmem:[#allocation9 + $0x1f0] ss:$8 sps:$4 sm:$0xff]   ;;  %v1721_v53 = vld [vmem:[#allocation9 + $0x204] ss:$8 sps:$4 sm:$0xff]  }
  0x48   :  { %763 = vmatpush1.bf16.msra.mxu0 %v1683_v9  ;;  %v1784_v54 = vld [vmem:[#allocation9 + $0x90] ss:$8 sps:$4 sm:$0xff]   ;;  %v2078_v55 = vld [vmem:[%s2188_s1 + $0x10] sm:$0xff]  ;;  %v1724_v60 = vld [vmem:[#allocation9 + $0x214] ss:$8 sps:$4 sm:$0xff]   ;;  %s2092_s12 = sld [smem:[#allocation5]] }
  0x49   :  { %764 = vmatprep.subr.bf16.mxu0 %v1684_v10  ;;  %720 = vmatpush1.bf16.msra.mxu1 %v1748_v30  ;;  %v1788_v57 = vld [vmem:[#allocation9 + $0xa4] ss:$8 sps:$4 sm:$0xff]   ;;  %v1719_v58 = vld [vmem:[#allocation9 + $0x200] ss:$8 sps:$4 sm:$0xff]   ;;  %v1433_v59 = vcombine.high %v2078_v55, %v2078_v55  ;;  %v1794_v62 = vld [vmem:[#allocation9 + $0xb4] ss:$8 sps:$4 sm:$0xff]  }
  0x4a   :  { %721 = vmatprep.subr.bf16.mxu1 %v1752_v31  ;;  %v1790_v61 = vld [vmem:[#allocation9 + $0xa0] ss:$8 sps:$4 sm:$0xff]   ;;  %v81_v63 = vld [vmem:[%s2188_s1] sm:$0xff]  ;;  %v1727_v2 = vld [vmem:[#allocation9 + $0x224] ss:$8 sps:$4 sm:$0xff]  }
  0x4b   :  { %v1722_v0 = vld [vmem:[#allocation9 + $0x210] ss:$8 sps:$4 sm:$0xff]   ;;  %v1429_v1 = vcombine.high %v81_v63, %v81_v63  ;;  %v1800_v4 = vld [vmem:[#allocation9 + $0xc4] ss:$8 sps:$4 sm:$0xff]   ;;  %v1725_v5 = vld [vmem:[#allocation9 + $0x220] ss:$8 sps:$4 sm:$0xff]   ;;  %v1428_v22 = vcombine.low %v81_v63, %v81_v63 }
  0x4c   :  { %765 = vmatpush1.bf16.msra.mxu0 %v1686_v11  ;;  %v1796_v3 = vld [vmem:[#allocation9 + $0xb0] ss:$8 sps:$4 sm:$0xff]   ;;  %v1733_v6 = vld [vmem:[#allocation9 + $0x234] ss:$8 sps:$4 sm:$0xff]   ;;  %v1802_v7 = vld [vmem:[#allocation9 + $0xc0] ss:$8 sps:$4 sm:$0xff]  }
  0x4d   :  { %766 = vmatprep.subr.bf16.mxu0 %v1687_v12  ;;  %722 = vmatpush1.bf16.msra.mxu1 %v1754_v34  ;;  %v1806_v8 = vld [vmem:[#allocation9 + $0xd4] ss:$8 sps:$4 sm:$0xff]   ;;  %v1731_v9 = vld [vmem:[#allocation9 + $0x230] ss:$8 sps:$4 sm:$0xff]   ;;  %v1739_v10 = vld [vmem:[#allocation9 + $0x244] ss:$8 sps:$4 sm:$0xff]  }
  0x4e   :  { %723 = vmatprep.subr.bf16.mxu1 %v1758_v35  ;;  %745 = vmatprep.mubr.bf16.mxu1 %v1429_v1  ;;  %v1808_v11 = vld [vmem:[#allocation9 + $0xd0] ss:$8 sps:$4 sm:$0xff]   ;;  %v1814_v12 = vld [vmem:[#allocation9 + $0xe4] ss:$8 sps:$4 sm:$0xff]   ;;  %v1737_v13 = vld [vmem:[#allocation9 + $0x240] ss:$8 sps:$4 sm:$0xff]  }
  0x4f   :  { %v1745_v14 = vld [vmem:[#allocation9 + $0x254] ss:$8 sps:$4 sm:$0xff]   ;;  %v1743_v17 = vld [vmem:[#allocation9 + $0x250] ss:$8 sps:$4 sm:$0xff]   ;;  %v1751_v18 = vld [vmem:[#allocation9 + $0x264] ss:$8 sps:$4 sm:$0xff]  }
  0x50   :  { %767 = vmatpush1.bf16.msra.mxu0 %v1689_v15  ;;  %v1816_v15 = vld [vmem:[#allocation9 + $0xe0] ss:$8 sps:$4 sm:$0xff]   ;;  %v1757_v21 = vld [vmem:[#allocation9 + $0x274] ss:$8 sps:$4 sm:$0xff]   ;;  %v1763_v24 = vld [vmem:[#allocation9 + $0x284] ss:$8 sps:$4 sm:$0xff]  }
  0x51   :  { %768 = vmatprep.subr.bf16.mxu0 %v1690_v16  ;;  %724 = vmatpush1.bf16.msra.mxu1 %v1760_v38  ;;  %v1817_v16 = vld [vmem:[#allocation9 + $0xf4] ss:$8 sps:$4 sm:$0xff]   ;;  %v1767_v27 = vld [vmem:[#allocation9 + $0x290] ss:$8 sps:$4 sm:$0xff]   ;;  %p877_p7 = scmp.eq.f32.partialorder %s2092_s12, 0.0 }
  0x52   :  { %725 = vmatprep.subr.bf16.mxu1 %v1764_v39  ;;  %v1769_v26 = vld [vmem:[#allocation9 + $0x294] ss:$8 sps:$4 sm:$0xff]   ;;  %v1779_v31 = vld [vmem:[#allocation9 + $0x2b0] ss:$8 sps:$4 sm:$0xff]  }
  0x53   :  { %v1781_v30 = vld [vmem:[#allocation9 + $0x2b4] ss:$8 sps:$4 sm:$0xff]   ;;  %v1791_v35 = vld [vmem:[#allocation9 + $0x2d0] ss:$8 sps:$4 sm:$0xff]  }
  0x54   :  { %769 = vmatpush1.bf16.msra.mxu0 %v1692_v19  ;;  %v1819_v19 = vld [vmem:[#allocation9 + $0xf0] ss:$8 sps:$4 sm:$0xff]   ;;  %v1793_v34 = vld [vmem:[#allocation9 + $0x2d4] ss:$8 sps:$4 sm:$0xff]  }
  0x55   :  { %770 = vmatprep.subr.bf16.mxu0 %v1693_v20  ;;  %726 = vmatpush1.bf16.msra.mxu1 %v1766_v42  ;;  %v1749_v20 = vld [vmem:[#allocation9 + $0x260] ss:$8 sps:$4 sm:$0xff]   ;;  %v1805_v38 = vld [vmem:[#allocation9 + $0x2f4] ss:$8 sps:$4 sm:$0xff]   ;;  %v1803_v39 = vld [vmem:[#allocation9 + $0x2f0] ss:$8 sps:$4 sm:$0xff]  }
  0x56   :  { %727 = vmatprep.subr.bf16.mxu1 %v1770_v43  ;;  %v1811_v42 = vld [vmem:[#allocation9 + $0x300] ss:$8 sps:$4 sm:$0xff]   ;;  %v1978_v43 = vmov 0  }
  0x58   :  { %771 = vmatpush1.bf16.msra.mxu0 %v1695_v23  ;;  %v1755_v23 = vld [vmem:[#allocation9 + $0x270] ss:$8 sps:$4 sm:$0xff]  }
  0x59   :  { %772 = vmatprep.subr.bf16.mxu0 %v1696_v25  ;;  %728 = vmatpush1.bf16.msra.mxu1 %v1772_v46  ;;  %v1761_v25 = vld [vmem:[#allocation9 + $0x280] ss:$8 sps:$4 sm:$0xff]  }
  0x5a   :  { %729 = vmatprep.subr.bf16.mxu1 %v1776_v47 }
  0x5c   :  { %773 = vmatpush1.bf16.msra.mxu0 %v1698_v28  ;;  %v1775_v28 = vld [vmem:[#allocation9 + $0x2a4] ss:$8 sps:$4 sm:$0xff]  }
  0x5d   :  { %774 = vmatprep.subr.bf16.mxu0 %v1699_v29  ;;  %730 = vmatpush1.bf16.msra.mxu1 %v1778_v50  ;;  %v1773_v29 = vld [vmem:[#allocation9 + $0x2a0] ss:$8 sps:$4 sm:$0xff]  }
  0x5e   :  { %731 = vmatprep.subr.bf16.mxu1 %v1782_v51 }
  0x60   :  { %775 = vmatpush1.bf16.msra.mxu0 %v1701_v32  ;;  %v1787_v32 = vld [vmem:[#allocation9 + $0x2c4] ss:$8 sps:$4 sm:$0xff]  }
  0x61   :  { %776 = vmatprep.subr.bf16.mxu0 %v1702_v33  ;;  %732 = vmatpush1.bf16.msra.mxu1 %v1784_v54  ;;  %v1785_v33 = vld [vmem:[#allocation9 + $0x2c0] ss:$8 sps:$4 sm:$0xff]  }
  0x62   :  { %733 = vmatprep.subr.bf16.mxu1 %v1788_v57 }
  0x64   :  { %777 = vmatpush1.bf16.msra.mxu0 %v1704_v36  ;;  %v1799_v36 = vld [vmem:[#allocation9 + $0x2e4] ss:$8 sps:$4 sm:$0xff]  }
  0x65   :  { %778 = vmatprep.subr.bf16.mxu0 %v1705_v37  ;;  %734 = vmatpush1.bf16.msra.mxu1 %v1790_v61  ;;  %v1797_v37 = vld [vmem:[#allocation9 + $0x2e0] ss:$8 sps:$4 sm:$0xff]  }
  0x66   :  { %735 = vmatprep.subr.bf16.mxu1 %v1794_v62 }
  0x68   :  { %779 = vmatpush1.bf16.msra.mxu0 %v1707_v40  ;;  %v1813_v40 = vld [vmem:[#allocation9 + $0x304] ss:$8 sps:$4 sm:$0xff]  }
  0x69   :  { %780 = vmatprep.subr.bf16.mxu0 %v1708_v41  ;;  %736 = vmatpush1.bf16.msra.mxu1 %v1796_v3  ;;  %v1432_v41 = vcombine.low %v2078_v55, %v2078_v55 }
  0x6a   :  { %737 = vmatprep.subr.bf16.mxu1 %v1800_v4 }
  0x6c   :  { %781 = vmatpush1.bf16.msra.mxu0 %v1710_v44  ;;  %v1822_v44 = vld [vmem:[%s2188_s1 + $0x18] ss:$0 sps:$4 sm:$0xff]  }
  0x6d   :  { %782 = vmatprep.subr.bf16.mxu0 %v1711_v45  ;;  %738 = vmatpush1.bf16.msra.mxu1 %v1802_v7 }
  0x6e   :  { %739 = vmatprep.subr.bf16.mxu1 %v1806_v8 }
  0x70   :  { %783 = vmatpush1.bf16.msra.mxu0 %v1713_v48 }
  0x71   :  { %784 = vmatprep.subr.bf16.mxu0 %v1714_v49  ;;  %740 = vmatpush1.bf16.msra.mxu1 %v1808_v11  ;;  %v185_v49 = vlaneseq }
  0x72   :  { %741 = vmatprep.subr.bf16.mxu1 %v1814_v12 }
  0x73   :  { %v186_v50 = vshrl.u32 %v185_v49, 7 }
  0x74   :  { %785 = vmatpush1.bf16.msra.mxu0 %v1716_v52  ;;  %v183_v52 = vld [vmem:[%s2190_s3] sm:$0x3] }
  0x75   :  { %795 = vmatprep.subr.bf16.mxu0 %v1721_v53  ;;  %742 = vmatpush1.bf16.msra.mxu1 %v1816_v15  ;;  %v187_v51 = vsub.s32 0, %v186_v50  ;;  %v191_v53 = vsub.s32 1, %v186_v50 }
  0x76   :  { %743 = vmatprep.subr.bf16.mxu1 %v1817_v16 }
  0x77   :  { %787 = vmatmul.mubr.bf16.vlgmr.msra.gmra.mrb[0].mxu0 %v1430_v56  ;;  %v188_v54 = vrot.slane %v183_v52, %v187_v51  ;;  %v192_v55 = vrot.slane %v183_v52, %v191_v53 }
  0x78   :  { %796 = vmatpush1.bf16.msra.mxu0 %v1719_v58  ;;  %827 = vmatprep.mubr.bf16.mxu0 %v1433_v59 }
  0x79   :  { %797 = vmatprep.subr.bf16.mxu0 %v1724_v60  ;;  %744 = vmatpush1.bf16.msra.mxu1 %v1819_v19 }
  0x7c   :  { %798 = vmatpush1.bf16.msra.mxu0 %v1722_v0  ;;  %746 = vmatmul.mubr.bf16.vlgmr.msra.gmra.mrb[0].mxu1 %v1428_v22 }
  0x7d   :  { %799 = vmatprep.subr.bf16.mxu0 %v1727_v2 }
  0x80   :  { %800 = vmatpush1.bf16.msra.mxu0 %v1725_v5 }
  0x81   :  { %801 = vmatprep.subr.bf16.mxu0 %v1733_v6 }
  0x84   :  { %802 = vmatpush1.bf16.msra.mxu0 %v1731_v9 }
  0x85   :  { %803 = vmatprep.subr.bf16.mxu0 %v1739_v10 }
  0x88   :  { %804 = vmatpush1.bf16.msra.mxu0 %v1737_v13 }
  0x89   :  { %805 = vmatprep.subr.bf16.mxu0 %v1745_v14 }
  0x8c   :  { %806 = vmatpush1.bf16.msra.mxu0 %v1743_v17 }
  0x8d   :  { %807 = vmatprep.subr.bf16.mxu0 %v1751_v18 }
  0x90   :  { %808 = vmatpush1.bf16.msra.mxu0 %v1749_v20 }
  0x91   :  { %809 = vmatprep.subr.bf16.mxu0 %v1757_v21 }
  0x94   :  { %810 = vmatpush1.bf16.msra.mxu0 %v1755_v23 }
  0x95   :  { %811 = vmatprep.subr.bf16.mxu0 %v1763_v24 }
  0x98   :  { %812 = vmatpush1.bf16.msra.mxu0 %v1761_v25 }
  0x99   :  { %813 = vmatprep.subr.bf16.mxu0 %v1769_v26 }
  0x9c   :  { %814 = vmatpush1.bf16.msra.mxu0 %v1767_v27 }
  0x9d   :  { %815 = vmatprep.subr.bf16.mxu0 %v1775_v28 }
  0xa0   :  { %816 = vmatpush1.bf16.msra.mxu0 %v1773_v29 }
  0xa1   :  { %817 = vmatprep.subr.bf16.mxu0 %v1781_v30 }
  0xa4   :  { %818 = vmatpush1.bf16.msra.mxu0 %v1779_v31 }
  0xa5   :  { %819 = vmatprep.subr.bf16.mxu0 %v1787_v32 }
  0xa8   :  { %820 = vmatpush1.bf16.msra.mxu0 %v1785_v33 }
  0xa9   :  { %821 = vmatprep.subr.bf16.mxu0 %v1793_v34 }
  0xac   :  { %822 = vmatpush1.bf16.msra.mxu0 %v1791_v35 }
  0xad   :  { %823 = vmatprep.subr.bf16.mxu0 %v1799_v36 }
  0xb0   :  { %824 = vmatpush1.bf16.msra.mxu0 %v1797_v37 }
  0xb1   :  { %825 = vmatprep.subr.bf16.mxu0 %v1805_v38 }
  0xb4   :  { %826 = vmatpush1.bf16.msra.mxu0 %v1803_v39 }
  0xb5   :  { %836 = vmatprep.subr.bf16.mxu0 %v1813_v40 }
  0xb7   :  { %828 = vmatmul.mubr.bf16.vlgmr.msra.gmra.mrb[0].mxu0 %v1432_v41 }
  0xb8   :  { %837 = vmatpush1.bf16.msra.mxu0 %v1811_v42  ;;  %868 = vmatprep.mubr.bf16.mxu0 %v1978_v43 }
  0xc3   :  { %1533 = vmatmul.mubr.msk.bf16.vlgmr.msra.gmra.mrb[0].mxu0 %vm709_vm0, %v1822_v44 }
 0x14f   :  { %v747_v45 = vpop.f32.mrb[0].mxu1 }
 0x150   :  { %v749_v46 = vpop.f32.mrb[1].mxu1  ;;  %v748_v56 = vadd.f32 %v747_v45, %v188_v54 }
 0x151   :  { %v751_v47 = vpop.f32.mrb[2].mxu1  ;;  %v750_v57 = vadd.f32 %v749_v46, %v192_v55 }
 0x152   :  { %v752_v48 = vpop.f32.mrb[3].mxu1 }
 0x193   :  { %880 = sbr.rel (!%p877_p7) target bundleno = 413 (0x19d), region = 57 }
 0x196   :  { %v870_v58 = vpop.f32.mrb[0].mxu0 }
 0x197   :  { %v1647_v59 = vadd.f32 %v870_v58, %v748_v56  ;;  %v872_v60 = vpop.f32.mrb[1].mxu0 }
 0x198   :  { %v1649_v61 = vadd.f32 %v872_v60, %v750_v57  ;;  %v874_v62 = vpop.f32.mrb[2].mxu0 }
 0x199   :  { %v875_v63 = vpop.f32.mrb[3].mxu0 }
 0x19a   :  { %v1575_v0 = vpack.c.bf16 %v1649_v61, %v1647_v59 }
 0x19c   :  { %889 = vst [vmem:[#allocation2] sm:$0xff] %v1575_v0 }
 0x19d PF:  { %p890_p8 = scmp.lt.f32.partialorder %s2092_s12, 0.0 }
 0x19e   :  { %v894_v1 = vstv (%p890_p8), %s2092_s12 }
 0x19f   :  { %893 = sbr.rel (!%p890_p8) target bundleno = 442 (0x1ba), region = 61  ;;  %v895_v2 = vadd.f32 (%p890_p8), %v1647_v59, %v894_v1  ;;  %v896_v3 = vadd.f32 (%p890_p8), %v1649_v61, %v894_v1 }
 0x1a1   :  { %v897_v4 = vmul.f32 (%p890_p8), %v895_v2, %v894_v1  ;;  %v898_v5 = vmul.f32 (%p890_p8), %v896_v3, %v894_v1 }
 0x1a3   :  { %v899_v6 = vsub.f32 (%p890_p8), 1.0, %v897_v4  ;;  %v900_v7 = vsub.f32 (%p890_p8), 1.0, %v898_v5 }
 0x1a5   :  { %1823 = vlog2.f32 (%p890_p8), %v899_v6 }
 0x1a6   :  { %1825 = vlog2.f32 %v900_v7 }
 0x1a7   :  { %1827 = vrcp.f32 %v894_v1 }
 0x1af   :  { %v1824_v8 = vpop.eup %1823 }
 0x1b0   :  { %v1826_v9 = vpop.eup %1825  ;;  %v902_v10 = vmul.f32 0.6931472, %v1824_v8 }
 0x1b1   :  { %v1828_v11 = vpop.eup %1827  ;;  %v904_v12 = vmul.f32 0.6931472, %v1826_v9 }
 0x1b2   :  { %v905_v13 = vsub.f32 0.0, %v902_v10 }
 0x1b3   :  { %v906_v14 = vsub.f32 0.0, %v904_v12 }
 0x1b4   :  { %v908_v15 = vmul.f32 %v1828_v11, %v905_v13 }
 0x1b5   :  { %v909_v16 = vmul.f32 %v1828_v11, %v906_v14 }
 0x1b7   :  { %v1576_v17 = vpack.c.bf16 %v909_v16, %v908_v15 }
 0x1b9   :  { %918 = vst [vmem:[#allocation2] sm:$0xff] %v1576_v17 }
 0x1ba PF:  { %p919_p9 = scmp.gt.f32.partialorder %s2092_s12, 0.0 }
 0x1bb   :  { %v923_v18 = vstv (%p919_p9), %s2092_s12 }
 0x1bc   :  { %922 = sbr.rel (!%p919_p9) target bundleno = 469 (0x1d5), region = 65  ;;  %v924_v19 = vmul.f32 (%p919_p9), %v1647_v59, %v923_v18  ;;  %v925_v20 = vmul.f32 (%p919_p9), %v1649_v61, %v923_v18  ;;  %1829 = vrcp.f32 (%p919_p9), %v923_v18 }
 0x1be   :  { %v926_v21 = vmul.f32 (%p919_p9), 1.442695, %v924_v19  ;;  %v928_v22 = vmul.f32 (%p919_p9), 1.442695, %v925_v20 }
 0x1c0   :  { %1831 = vpow2.f32 (%p919_p9), %v926_v21 }
 0x1c1   :  { %1833 = vpow2.f32 (%p919_p9), %v928_v22 }
 0x1c6   :  { %v1830_v23 = vpop.eup %1829 }
 0x1ca   :  { %v1832_v24 = vpop.eup %1831 }
 0x1cb   :  { %v1834_v25 = vpop.eup %1833  ;;  %v1536_v26 = vadd.f32 -1.0, %v1832_v24 }
 0x1cc   :  { %v1537_v27 = vadd.f32 -1.0, %v1834_v25 }
 0x1cd   :  { %v933_v28 = vmul.f32 %v1830_v23, %v1536_v26 }
 0x1ce   :  { %v934_v29 = vmul.f32 %v1830_v23, %v1537_v27 }
 0x1cf   :  { %v935_v30 = vadd.f32 %v933_v28, %v923_v18 }
 0x1d0   :  { %v936_v31 = vadd.f32 %v934_v29, %v923_v18 }
 0x1d2   :  { %v1577_v32 = vpack.c.bf16 %v936_v31, %v935_v30 }
 0x1d4   :  { %945 = vst [vmem:[#allocation2] sm:$0xff] %v1577_v32 }
 0x1d5 PF:  { %v1835_v33 = vld [vmem:[#allocation10 + $0x40] sm:$0xff]   ;;  %v1837_v35 = vld [vmem:[#allocation10 + $0x48] sm:$0xff]   ;;  %v1839_v37 = vld [vmem:[#allocation10 + $0x50] sm:$0xff]   ;;  %p1129_p10 = scmp.eq.f32.partialorder %s2064_s24, 0.0 }
 0x1d6   :  { %v1836_v34 = vld [vmem:[#allocation10] sm:$0xff]   ;;  %1578 = vmatprep.subr.bf16.mxu1 %v1835_v33  ;;  %v1838_v36 = vld [vmem:[#allocation10 + $0x8] sm:$0xff]   ;;  %v1840_v38 = vld [vmem:[#allocation10 + $0x10] sm:$0xff]  }
 0x1d7   :  { %1579 = vmatpush3.bf16.msra.mxu1 %v1836_v34  ;;  %v1841_v39 = vld [vmem:[#allocation10 + $0x58] sm:$0xff]   ;;  %v1843_v41 = vld [vmem:[#allocation10 + $0x60] sm:$0xff]   ;;  %v1845_v43 = vld [vmem:[#allocation10 + $0x68] sm:$0xff]  }
 0x1d8   :  { %1580 = vmatprep.subr.bf16.mxu1 %v1837_v35  ;;  %v1842_v40 = vld [vmem:[#allocation10 + $0x18] sm:$0xff]   ;;  %v1844_v42 = vld [vmem:[#allocation10 + $0x20] sm:$0xff]   ;;  %v1846_v46 = vld [vmem:[#allocation10 + $0x28] sm:$0xff]  }
 0x1d9   :  { %v1847_v47 = vld [vmem:[#allocation10 + $0x70] sm:$0xff]   ;;  %v1849_v49 = vld [vmem:[#allocation10 + $0x78] sm:$0xff]   ;;  %v1539_v53 = vld [vmem:[%s2192_s5] ss:$0 sm:$0xff] }
 0x1da   :  { %v1848_v48 = vld [vmem:[#allocation10 + $0x30] sm:$0xff]   ;;  %v1850_v50 = vld [vmem:[#allocation10 + $0x38] sm:$0xff]  }
 0x1db   :  { %1581 = vmatpush3.bf16.msra.mxu1 %v1838_v36  ;;  %v946_v44 = vld [vmem:[#allocation2] sm:$0xff] }
 0x1dc   :  { %1582 = vmatprep.subr.bf16.mxu1 %v1839_v37  ;;  %v1541_v45 = vcombine.high %v946_v44, %v946_v44  ;;  %v1540_v51 = vcombine.low %v946_v44, %v946_v44 }
 0x1de   :  { %1121 = vmatprep.mubr.bf16.mxu1 %v1541_v45 }
 0x1df   :  { %1583 = vmatpush3.bf16.msra.mxu1 %v1840_v38 }
 0x1e0   :  { %1584 = vmatprep.subr.bf16.mxu1 %v1841_v39 }
 0x1e3   :  { %1585 = vmatpush3.bf16.msra.mxu1 %v1842_v40 }
 0x1e4   :  { %1586 = vmatprep.subr.bf16.mxu1 %v1843_v41 }
 0x1e7   :  { %1587 = vmatpush3.bf16.msra.mxu1 %v1844_v42 }
 0x1e8   :  { %1588 = vmatprep.subr.bf16.mxu1 %v1845_v43 }
 0x1eb   :  { %1589 = vmatpush3.bf16.msra.mxu1 %v1846_v46 }
 0x1ec   :  { %1590 = vmatprep.subr.bf16.mxu1 %v1847_v47 }
 0x1ef   :  { %1591 = vmatpush3.bf16.msra.mxu1 %v1848_v48 }
 0x1f0   :  { %1592 = vmatprep.subr.bf16.mxu1 %v1849_v49 }
 0x1f3   :  { %1593 = vmatpush3.bf16.msra.mxu1 %v1850_v50 }
 0x1f6   :  { %1122 = vmatmul.mubr.bf16.vlgmr.msra.gmra.mrb[4].mxu1 %v1540_v51 }
 0x2c7   :  { %1132 = sbr.rel (!%p1129_p10) target bundleno = 722 (0x2d2), region = 69 }
 0x2c9   :  { %v1594_v52 = vpop.f32.mrb[4].mxu1 }
 0x2ca   :  { %v1595_v54 = vpop.f32.mrb[5].mxu1 }
 0x2cb   :  { %v1596_v55 = vadd.f32 %v1595_v54, %v1594_v52  ;;  %v1597_v56 = vpop.f32.mrb[6].mxu1 }
 0x2cc   :  { %v1598_v57 = vpop.f32.mrb[7].mxu1 }
 0x2cd   :  { %v1124_v58 = vadd.f32 %v1596_v55, %v1539_v53 }
 0x2cf   :  { %v1133_v59 = vpack.c.bf16 %v1124_v58, %v1124_v58 }
 0x2d1   :  { %1134 = vst [vmem:[#allocation3] sm:$0xf] %v1133_v59 }
 0x2d2 PF:  { %p1135_p11 = scmp.lt.f32.partialorder %s2064_s24, 0.0 }
 0x2d3   :  { %v1139_v60 = vstv (%p1135_p11), %s2064_s24 }
 0x2d4   :  { %1138 = sbr.rel (!%p1135_p11) target bundleno = 750 (0x2ee), region = 73  ;;  %v1140_v61 = vadd.f32 (%p1135_p11), %v1139_v60, %v1124_v58 }
 0x2d6   :  { %v1141_v62 = vmul.f32 (%p1135_p11), %v1140_v61, %v1139_v60 }
 0x2d8   :  { %v1142_v63 = vsub.f32 (%p1135_p11), 1.0, %v1141_v62 }
 0x2da   :  { %1853 = vlog2.f32 (%p1135_p11), %v1142_v63 }
 0x2db   :  { %1855 = vrcp.f32 %v1139_v60 }
 0x2e4   :  { %v1854_v0 = vpop.eup %1853 }
 0x2e5   :  { %v1144_v1 = vmul.f32 0.6931472, %v1854_v0  ;;  %v1856_v2 = vpop.eup %1855 }
 0x2e7   :  { %v1145_v3 = vsub.f32 0.0, %v1144_v1 }
 0x2e9   :  { %v1147_v4 = vmul.f32 %v1856_v2, %v1145_v3 }
 0x2eb   :  { %v1148_v5 = vpack.c.bf16 %v1147_v4, %v1147_v4 }
 0x2ed   :  { %1149 = vst [vmem:[#allocation3] sm:$0xf] %v1148_v5 }
 0x2ee PF:  { %p1150_p12 = scmp.gt.f32.partialorder %s2064_s24, 0.0 }
 0x2ef   :  { %v1154_v6 = vstv (%p1150_p12), %s2064_s24 }
 0x2f0   :  { %1153 = sbr.rel (!%p1150_p12) target bundleno = 776 (0x308), region = 77  ;;  %v1155_v7 = vmul.f32 (%p1150_p12), %v1154_v6, %v1124_v58  ;;  %1857 = vrcp.f32 (%p1150_p12), %v1154_v6 }
 0x2f2   :  { %v1156_v8 = vmul.f32 (%p1150_p12), 1.442695, %v1155_v7 }
 0x2f4   :  { %1859 = vpow2.f32 (%p1150_p12), %v1156_v8 }
 0x2fa   :  { %v1858_v9 = vpop.eup %1857 }
 0x2fe   :  { %v1860_v10 = vpop.eup %1859 }
 0x2ff   :  { %v1558_v11 = vadd.f32 -1.0, %v1860_v10 }
 0x301   :  { %v1160_v12 = vmul.f32 %v1858_v9, %v1558_v11 }
 0x303   :  { %v1161_v13 = vadd.f32 %v1160_v12, %v1154_v6 }
 0x305   :  { %v1162_v14 = vpack.c.bf16 %v1161_v13, %v1161_v13 }
 0x307   :  { %1163 = vst [vmem:[#allocation3] sm:$0xf] %v1162_v14 }
 0x308 PF:  { %v1861_v15 = vld [vmem:[%s2193_s6] sm:$0xff]   ;;  %v1979_v16 = vmov 0.0   ;;  %v1862_v17 = vld [vmem:[%s2193_s6 + $0x8] sm:$0xff]   ;;  %vm1980_vm1 = vmmov 0   ;;  %v1863_v18 = vld [vmem:[%s2193_s6 + $0x10] sm:$0xff]   ;;  %p1276_p13 = scmp.eq.f32.partialorder %s2066_s0, 0.0 }
 0x309   :  { %1614 = vmatprep.subr.bf16.mxu1 %v1979_v16  ;;  %1630 = vmatprep.mubr.msk.bf16.mxu1 %vm1980_vm1, %v1979_v16  ;;  %v1864_v19 = vld [vmem:[%s2193_s6 + $0x18] sm:$0xff]   ;;  %v1865_v20 = vld [vmem:[%s2193_s6 + $0x20] sm:$0xff]   ;;  %v1866_v21 = vld [vmem:[%s2193_s6 + $0x28] sm:$0xff]   ;;  %vm1281_vm2 = vcmask (%p1276_p13), 519168  }
 0x30a   :  { %1615 = vmatpush3.bf16.msra.mxu1 %v1861_v15  ;;  %v1867_v22 = vld [vmem:[%s2193_s6 + $0x30] sm:$0xff]   ;;  %v1868_v23 = vld [vmem:[%s2193_s6 + $0x38] sm:$0xff]   ;;  %v1559_v25 = vld [vmem:[%s2194_s7] ss:$0 sm:$0xff] }
 0x30b   :  { %1616 = vmatprep.subr.bf16.mxu1 %v1979_v16 }
 0x30e   :  { %1617 = vmatpush3.bf16.msra.mxu1 %v1862_v17  ;;  %v1164_v24 = vld [vmem:[#allocation3] sm:$0xf] }
 0x30f   :  { %1618 = vmatprep.subr.bf16.mxu1 %v1979_v16 }
 0x312   :  { %1619 = vmatpush3.bf16.msra.mxu1 %v1863_v18 }
 0x313   :  { %1620 = vmatprep.subr.bf16.mxu1 %v1979_v16 }
 0x316   :  { %1621 = vmatpush3.bf16.msra.mxu1 %v1864_v19 }
 0x317   :  { %1622 = vmatprep.subr.bf16.mxu1 %v1979_v16 }
 0x31a   :  { %1623 = vmatpush3.bf16.msra.mxu1 %v1865_v20 }
 0x31b   :  { %1624 = vmatprep.subr.bf16.mxu1 %v1979_v16 }
 0x31e   :  { %1625 = vmatpush3.bf16.msra.mxu1 %v1866_v21 }
 0x31f   :  { %1626 = vmatprep.subr.bf16.mxu1 %v1979_v16 }
 0x322   :  { %1627 = vmatpush3.bf16.msra.mxu1 %v1867_v22 }
 0x323   :  { %1628 = vmatprep.subr.bf16.mxu1 %v1979_v16 }
 0x326   :  { %1629 = vmatpush3.bf16.msra.mxu1 %v1868_v23 }
 0x329   :  { %1631 = vmatmul.mubr.bf16.vlgmr.msra.gmra.mrb[8].mxu1 %v1164_v24 }
 0x3f9   :  { %1279 = sbr.rel (!%p1276_p13) target bundleno = 1026 (0x402), region = 81 }
 0x3fc   :  { %v1270_v26 = vpop.f32.mrb[8].mxu1 }
 0x3fd   :  { %v1271_v27 = vadd.f32 %v1559_v25, %v1270_v26  ;;  %v1632_v28 = vpop.f32.mrb[9].mxu1 }
 0x3fe   :  { %v1273_v29 = vpop.f32.mrb[10].mxu1 }
 0x3ff   :  { %v1633_v30 = vpop.f32.mrb[11].mxu1  ;;  %v1280_v31 = vpack.c.bf16 (%p1276_p13), %v1271_v27, %v1271_v27 }
 0x401   :  { %1282 = vst.msk [vmem:[#allocation4] sm:$0xf] %vm1281_vm2, %v1280_v31 }
 0x402 PF:  { %p1283_p0 = scmp.lt.f32.partialorder %s2066_s0, 0.0 }
 0x403   :  { %v1287_v32 = vstv (%p1283_p0), %s2066_s0  ;;  %vm1297_vm3 = vcmask (%p1283_p0), 519168  }
 0x404   :  { %1286 = sbr.rel (!%p1283_p0) target bundleno = 1054 (0x41e), region = 85  ;;  %v1288_v33 = vadd.f32 (%p1283_p0), %v1287_v32, %v1271_v27 }
 0x406   :  { %v1289_v34 = vmul.f32 (%p1283_p0), %v1288_v33, %v1287_v32 }
 0x408   :  { %v1290_v35 = vsub.f32 (%p1283_p0), 1.0, %v1289_v34 }
 0x40a   :  { %1869 = vlog2.f32 (%p1283_p0), %v1290_v35 }
 0x40b   :  { %1871 = vrcp.f32 %v1287_v32 }
 0x414   :  { %v1870_v36 = vpop.eup %1869 }
 0x415   :  { %v1292_v37 = vmul.f32 0.6931472, %v1870_v36  ;;  %v1872_v38 = vpop.eup %1871 }
 0x417   :  { %v1293_v39 = vsub.f32 0.0, %v1292_v37 }
 0x419   :  { %v1295_v40 = vmul.f32 %v1872_v38, %v1293_v39 }
 0x41b   :  { %v1296_v41 = vpack.c.bf16 %v1295_v40, %v1295_v40 }
 0x41d   :  { %1298 = vst.msk [vmem:[#allocation4] sm:$0xf] %vm1297_vm3, %v1296_v41 }
 0x41e PF:  { %p1299_p1 = scmp.gt.f32.partialorder %s2066_s0, 0.0 }
 0x41f   :  { %v1303_v42 = vstv (%p1299_p1), %s2066_s0  ;;  %vm1312_vm4 = vcmask (%p1299_p1), 519168  }
 0x420   :  { %1302 = sbr.rel (!%p1299_p1) target bundleno = 1080 (0x438), region = 89  ;;  %v1304_v43 = vmul.f32 (%p1299_p1), %v1303_v42, %v1271_v27  ;;  %1873 = vrcp.f32 (%p1299_p1), %v1303_v42 }
 0x422   :  { %v1305_v44 = vmul.f32 (%p1299_p1), 1.442695, %v1304_v43 }
 0x424   :  { %1875 = vpow2.f32 (%p1299_p1), %v1305_v44 }
 0x42a   :  { %v1874_v45 = vpop.eup %1873 }
 0x42e   :  { %v1876_v46 = vpop.eup %1875 }
 0x42f   :  { %v1568_v47 = vadd.f32 -1.0, %v1876_v46 }
 0x431   :  { %v1309_v48 = vmul.f32 %v1874_v45, %v1568_v47 }
 0x433   :  { %v1310_v49 = vadd.f32 %v1309_v48, %v1303_v42 }
 0x435   :  { %v1311_v50 = vpack.c.bf16 %v1310_v49, %v1310_v49 }
 0x437   :  { %1313 = vst.msk [vmem:[#allocation4] sm:$0xf] %vm1312_vm4, %v1311_v50 }
 0x438 PF:  { %1634 = vmatprep.subr.bf16.mxu1 %v1979_v16  ;;  %v1877_v51 = vld [vmem:[%s2195_s8] sm:$0xff]   ;;  %1642 = vmatprep.mubr.msk.bf16.mxu1 %vm1980_vm1, %v1979_v16  ;;  %v1878_v52 = vld [vmem:[%s2195_s8 + $0x8] sm:$0xff]   ;;  %v1879_v53 = vld [vmem:[%s2195_s8 + $0x10] sm:$0xff]   ;;  %vm1354_vm5 = vcmask 523264  }
 0x439   :  { %1635 = vmatpush3.bf16.msra.mxu1 %v1877_v51  ;;  %v1880_v54 = vld [vmem:[%s2195_s8 + $0x18] sm:$0xff]   ;;  %v1569_v56 = vld [vmem:[%s2196_s9] ss:$0 sm:$0xff]  ;;  %s1981_s8 = smov [#allocation12]  }
 0x43a   :  { %1636 = vmatprep.subr.bf16.mxu1 %v1979_v16  ;;  %s1415_s5 = sshll.u32 %s1981_s8, 4  ;;  %s1416_s5 = int_to_ptr.vmem [resolvable:$true] %s1415_s5 }
 0x43b   :  { %s1941_s9 = scalar_lea.vmem %s1416_s5, 128  ;;  %p1946_p3 = scmp.lt.s32.totalorder %s1416_s5, %s1416_s5 }
 0x43c   :  { %p1942_p2 = scmp.ne.s32.totalorder %s1416_s5, %s1941_s9  ;;  %p1947_p4 = scmp.lt.s32.totalorder %s1941_s9, %s1941_s9 }
 0x43d   :  { %1637 = vmatpush3.bf16.msra.mxu1 %v1878_v52 }
 0x43e   :  { %1638 = vmatprep.subr.bf16.mxu1 %v1979_v16  ;;  %v1314_v55 = vld [vmem:[#allocation4] sm:$0xf]  ;;  %p1948_p5 = por %p1947_p4, %p1946_p3 }
 0x440   :  { %p1949_p6 = pnand %p1948_p5, %p1942_p2 }
 0x441   :  { %1639 = vmatpush3.bf16.msra.mxu1 %v1879_v53 }
 0x442   :  { %1640 = vmatprep.subr.bf16.mxu1 %v1979_v16 }
 0x445   :  { %1641 = vmatpush3.bf16.msra.mxu1 %v1880_v54 }
 0x448   :  { %1643 = vmatmul.mubr.msk.bf16.vlgmr.msra.gmra.mrb[12].mxu1 %vm1354_vm5, %v1314_v55 }
 0x51b   :  { %v1392_v57 = vpop.f32.mrb[12].mxu1 }
 0x51c   :  { %v1393_v58 = vadd.f32 %v1569_v56, %v1392_v57  ;;  %v1644_v59 = vpop.f32.mrb[13].mxu1 }
 0x51d   :  { %v1395_v60 = vpop.f32.mrb[14].mxu1 }
 0x51e   :  { %1398 = vmax.xlane.f32.xlu0 %v1393_v58  ;;  %v1645_v61 = vpop.f32.mrb[15].mxu1 }
 0x5ab   :  { %v1399_v62 = vpop.xlane.xlu0 %1398 }
 0x5ac   :  { %v1400_v63 = vsub.f32 %v1393_v58, %v1399_v62 }
 0x5ae   :  { %v1401_v0 = vmul.f32 1.442695, %v1400_v63 }
 0x5b0   :  { %1881 = vpow2.f32 %v1401_v0 }
 0x5ba   :  { %v1882_v1 = vpop.eup %1881 }
 0x5bb   :  { %1403 = vadd.xlane.f32.xlu0 %v1882_v1 }
 0x648   :  { %v1404_v2 = vpop.xlane.xlu0 %1403 }
 0x649   :  { %1883 = vlog2.f32 %v1404_v2 }
 0x653   :  { %v1884_v3 = vpop.eup %1883 }
 0x654   :  { %v1406_v4 = vmul.f32 0.6931472, %v1884_v3 }
 0x656   :  { %v1407_v5 = vsub.f32 %v1400_v63, %v1406_v4 }
 0x658   :  { %1408 = vst [vmem:[#allocation12] sm:$0xff] %v1407_v5 }
 0x659   :  { %1952 = shalt.err (!%p1949_p6)
}
 0x65a   :  { %s1953_s17 = scalar_lea.hbm %s2197_s10, 128 }
 0x65b   :  { %p1954_p7 = scmp.ne.s32.totalorder %s2197_s10, %s1953_s17  ;;  %p1957_p8 = scmp.lt.u32.totalorder %s1953_s17, %s2197_s10 }
 0x65d   :  { %p1959_p9 = pnand %p1957_p8, %p1954_p7 }
 0x65f   :  { %1962 = shalt.err (!%p1959_p9)
}
 0x660   :  { %1418 = dma.vmem_to_hbm [thread:$0]  %s1416_s5, 128, %s2197_s10, [#allocation7]  }
 0x661   :  { %1969 = dma.done.wait [#allocation7], 128  }
 0x662   :  { %1970 = vsyncadd [#allocation7], 4294967168 }
 0x663   :  { %1422 = vsyncpa [#allocation6], 1 }
 0x664   :  { %1423 = vsyncpa [#allocation11], 1 }
 0x665   :  { %1424 = vsyncpa [#allocation7], 1 }
 0x666   :  { %1425 = vsyncpa [#allocation8], 1 }

</bundles_post_ra>
